<compile_context>
chip_gen: v5e
topology: v5e:2x2
jax: 0.10.0
libtpu: 0.0.40
codegen_flags: <defaults>
</compile_context>

<pallas_src>
import math

import jax
import jax.numpy as jnp
from jax.experimental import pallas as pl
from jax.experimental.pallas import tpu as pltpu


def _make_from_rgb_kernel(scale):
    """1x1-conv kernel: o = (W * scale) @ x + b for one (batch, spatial-tile)."""

    def kernel(x_ref, w_ref, b_ref, o_ref):
        # x_ref: (1, C_in, TF)   w_ref: (C_out, C_in)   b_ref: (C_out, 1)
        # o_ref: (1, C_out, TF)
        x = x_ref[0].astype(jnp.float32)                    # (C_in, TF)
        w = w_ref[...].astype(jnp.float32) * scale          # equalized-LR scale (static const)
        acc = jnp.dot(w, x, preferred_element_type=jnp.float32)  # (C_out, TF)
        acc = acc + b_ref[...].astype(jnp.float32)          # broadcast bias over lanes
        o_ref[0] = acc.astype(o_ref.dtype)

    return kernel


def _pick_spatial_tile(hw, max_tile=2048):
    """Largest lane-dense tile (multiple of 128) that divides hw, capped at max_tile."""
    if hw % 128 != 0:
        # Fall back to a single full-extent block (legal; masked stores but correct).
        return hw
    tf = min(hw, max_tile)
    tf -= tf % 128
    while hw % tf != 0:
        tf -= 128
    return tf


def from_rgb(x, weight, bias):
    """Pallas equivalent of FromRGBLayer.forward.

    x:      (N, C_in, H, W)   NCHW, same as PyTorch
    weight: (C_out, C_in, 1, 1)  raw (pre-scale) conv weight, as stored by EqualizedLR
    bias:   (C_out,)
    returns (N, C_out, H, W)
    """
    n, c_in, h, w_sp = x.shape
    c_out, c_in_w, kh, kw = weight.shape
    assert (c_in_w, kh, kw) == (c_in, 1, 1), "FromRGBLayer uses a 1x1 conv"
    hw = h * w_sp

    # Equalized learning-rate scale (He constant), applied at forward time.
    # TODO(synk): if the repo's EqualizedLR uses a different gain convention,
    # adjust this constant; the kernel itself is unchanged.
    fan_in = c_in * kh * kw
    scale = math.sqrt(2.0 / fan_in)

    # Free, contiguous reshapes in the wrapper (metadata only).
    x_flat = x.reshape(n, c_in, hw)
    w2d = weight.reshape(c_out, c_in)
    b2d = bias.reshape(c_out, 1)

    tf = _pick_spatial_tile(hw)
    grid = (n, hw // tf)

    out_flat = pl.pallas_call(
        _make_from_rgb_kernel(scale),
        out_shape=jax.ShapeDtypeStruct((n, c_out, hw), x.dtype),
        grid_spec=pl.GridSpec(
            grid=grid,
            in_specs=[
                pl.BlockSpec((1, c_in, tf), lambda i, j: (i, 0, j)),
                pl.BlockSpec((c_out, c_in), lambda i, j: (0, 0)),
                pl.BlockSpec((c_out, 1), lambda i, j: (0, 0)),
            ],
            out_specs=pl.BlockSpec((1, c_out, tf), lambda i, j: (i, 0, j)),
        ),
        compiler_params=pltpu.CompilerParams(
            dimension_semantics=("parallel", "parallel"),
        ),
    )(x_flat, w2d, b2d)

    return out_flat.reshape(n, c_out, h, w_sp)


if __name__ == "__main__":
    key = jax.random.PRNGKey(0)
    k_x, k_w, k_b = jax.random.split(key, 3)

    # Small shapes consistent with FromRGBLayer: RGB input, out_c from resl_to_ch.
    n, rgb_channel, hh, ww = 2, 3, 16, 16
    out_c = 32

    x = jax.random.normal(k_x, (n, rgb_channel, hh, ww), dtype=jnp.float32)
    weight = jax.random.normal(k_w, (out_c, rgb_channel, 1, 1), dtype=jnp.float32)
    bias = jax.random.normal(k_b, (out_c,), dtype=jnp.float32)

    y = from_rgb(x, weight, bias)
    y = jax.block_until_ready(y)

    # Reference: plain JAX 1x1 conv with equalized-LR scaling.
    scale = math.sqrt(2.0 / rgb_channel)
    y_ref = (
        jnp.einsum("oc,nchw->nohw", weight.reshape(out_c, rgb_channel) * scale, x)
        + bias[None, :, None, None]
    )

    assert y.shape == (n, out_c, hh, ww), y.shape
    assert jnp.allclose(y, y_ref, atol=1e-5, rtol=1e-5), "Pallas FromRGB mismatch vs reference"

    print("KERNEL_OK")
</pallas_src>

<mosaic_0001>
module attributes {stable_mosaic.version = 11 : i64} {
  func.func @kernel(%arg0: i32, %arg1: i32, %arg2: memref<1x3x256xf32, #tpu.memory_space<vmem>>, %arg3: memref<32x3xf32, #tpu.memory_space<vmem>>, %arg4: memref<32x1xf32, #tpu.memory_space<vmem>>, %arg5: memref<1x32x256xf32, #tpu.memory_space<vmem>>) attributes {dimension_semantics = [#tpu.dimension_semantics<parallel>, #tpu.dimension_semantics<parallel>], iteration_bounds = array<i64: 2, 1>, scalar_prefetch = 0 : i64, scratch_operands = 0 : i64, tpu.core_type = #tpu.core_type<tc>, window_params = [{transform_indices = @transform_0, window_bounds = array<i64: 1, 3, 256>}, {pipeline_mode = #tpu.pipeline_mode<synchronous>, transform_indices = @transform_1, window_bounds = array<i64: 32, 3>}, {pipeline_mode = #tpu.pipeline_mode<synchronous>, transform_indices = @transform_2, window_bounds = array<i64: 32, 1>}, {transform_indices = @transform_3, window_bounds = array<i64: 1, 32, 256>}]} {
    %c0 = arith.constant 0 : index
    %c0_0 = arith.constant 0 : index
    %c0_1 = arith.constant 0 : index
    %0 = vector.load %arg2[%c0, %c0_0, %c0_1] : memref<1x3x256xf32, #tpu.memory_space<vmem>>, vector<1x3x256xf32>
    %1 = vector.shape_cast %0 : vector<1x3x256xf32> to vector<3x256xf32>
    %c0_2 = arith.constant 0 : index
    %c0_3 = arith.constant 0 : index
    %2 = vector.load %arg3[%c0_2, %c0_3] : memref<32x3xf32, #tpu.memory_space<vmem>>, vector<32x3xf32>
    %cst = arith.constant 0.816496611 : f32
    %3 = vector.broadcast %cst : f32 to vector<32x3xf32>
    %4 = arith.mulf %2, %3 : vector<32x3xf32>
    %cst_4 = arith.constant dense<0.000000e+00> : vector<32x256xf32>
    %5 = tpu.matmul %4, %1, %cst_4 {dimension_numbers = #tpu.dot_dimension_numbers<[1], [0], [0], [1], [0, 0, 1, 1], [], []>} : vector<32x3xf32>, vector<3x256xf32>, vector<32x256xf32> -> vector<32x256xf32>
    %c0_5 = arith.constant 0 : index
    %c0_6 = arith.constant 0 : index
    %6 = vector.load %arg4[%c0_5, %c0_6] : memref<32x1xf32, #tpu.memory_space<vmem>>, vector<32x1xf32>
    %7 = vector.broadcast %6 : vector<32x1xf32> to vector<32x256xf32>
    %8 = arith.addf %5, %7 : vector<32x256xf32>
    %c0_7 = arith.constant 0 : index
    %c0_8 = arith.constant 0 : index
    %c0_9 = arith.constant 0 : index
    %9 = vector.load %arg5[%c0_7, %c0_8, %c0_9] : memref<1x32x256xf32, #tpu.memory_space<vmem>>, vector<1x32x256xf32>
    %10 = vector.shape_cast %9 : vector<1x32x256xf32> to vector<32x256xf32>
    %11 = vector.shape_cast %8 : vector<32x256xf32> to vector<1x32x256xf32>
    tpu.vector_store %arg5[%c0_7, %c0_8, %c0_9], %11 {strides = array<i32>} : memref<1x32x256xf32, #tpu.memory_space<vmem>>, vector<1x32x256xf32>,
    return
  }
  func.func @transform_0(%arg0: i32, %arg1: i32) -> (i32, i32, i32) {
    %c0_i32 = arith.constant 0 : i32
    %c0_i32_0 = arith.constant 0 : i32
    return %arg0, %c0_i32, %arg1 : i32, i32, i32
  }
  func.func @transform_1(%arg0: i32, %arg1: i32) -> (i32, i32) {
    %c0_i32 = arith.constant 0 : i32
    %c0_i32_0 = arith.constant 0 : i32
    %c0_i32_1 = arith.constant 0 : i32
    return %c0_i32, %c0_i32_0 : i32, i32
  }
  func.func @transform_2(%arg0: i32, %arg1: i32) -> (i32, i32) {
    %c0_i32 = arith.constant 0 : i32
    %c0_i32_0 = arith.constant 0 : i32
    %c0_i32_1 = arith.constant 0 : i32
    return %c0_i32, %c0_i32_0 : i32, i32
  }
  func.func @transform_3(%arg0: i32, %arg1: i32) -> (i32, i32, i32) {
    %c0_i32 = arith.constant 0 : i32
    %c0_i32_0 = arith.constant 0 : i32
    return %arg0, %c0_i32, %arg1 : i32, i32, i32
  }
}

</mosaic_0001>

<bundles_post_ra>
// kernel: tpu_custom_call.1
= control target key start
LH: loop header
LB: loop body
LE: loop exit
PB: predicated region body
PF: predicated region fallthrough
CT: control target
= control target key end

     0   :  { %8 = vsyncpa [#allocation3], 0  ;;  %s741_s0 = inlined_call_operand.vmem [shape: f32[2,3,256], index: 0, kind: input, shape index: {}]   ;;  %s742_s1 = inlined_call_operand.vmem [shape: f32[32,3], index: 1, kind: input, shape index: {}]   ;;  %s743_s2 = inlined_call_operand.vmem [shape: f32[32,1], index: 2, kind: input, shape index: {}]   ;;  %s744_s3 = inlined_call_operand.hbm [shape: f32[2,32,256], index: 3, kind: output, shape index: {}]  }
   0x1   :  { %10 = vsyncpa [#allocation3 + $0x1], 0  ;;  %s608_s12 = smov 0   ;;  %s610_s13 = smov 0  }
   0x2   :  { %s612_s14 = smov 0   ;;  %s614_s15 = smov 0  }
   0x3   :  { %s616_s16 = smov 0   ;;  %s618_s17 = smov 0  }
   0x4 LB: > { %s418_s18 = sadd.s32 4294967295, %s583_s17   ;;  %s419_s19 = sadd.s32 4294967294, %s583_s17   ;;  %s583_s17 = sphi %s618_s17, %s16_s17   ;;  %s579_s16 = sphi %s616_s16, %s751_s16   ;;  %s575_s15 = sphi %s614_s15, %s750_s15   ;;  %s571_s14 = sphi %s612_s14, %s749_s14   ;;  %s567_s13 = sphi %s610_s13, %s748_s13   ;;  %s563_s12 = sphi %s608_s12, %s747_s12  }
   0x5   : > { %s28_s20 = sadd.s32 1, %s579_s16  ;;  %s107_s21 = sadd.s32 1, %s571_s14 }
   0x6   : > { %p30_p0 = scmp.ge.s32.totalorder %s28_s20, 2  ;;  %p117_p1 = scmp.ne.s32.totalorder %s571_s14, %s567_s13 }
   0x7   : > { %p118_p2 = scmp.eq.s32.totalorder %s418_s18, 1  ;;  %p123_p3 = scmp.ne.s32.totalorder %s567_s13, %s563_s12 }
   0x8   : > { %s753_s20 = smov (%p30_p0, %s28_s20), 0  ;;  %p124_p5 = scmp.eq.s32.totalorder %s419_s19, 1 }
   0x9   : > { %p648_p4 = por %p118_p2, %p117_p1  ;;  %s102_s23 = ssub.s32 %s579_s16, %s753_s20 }
   0xa   : > { %p422_p6 = scmp.ge.s32.totalorder %s583_s17, 1  ;;  %p105_p7 = scmp.eq.s32.totalorder %s102_s23, 0 }
   0xb   : > { %p655_p8 = por %p124_p5, %p123_p3  ;;  %p161_p9 = scmp.lt.s32.totalorder %s583_s17, 3 }
   0xc   : > { %s661_s25 = scalar_select %p105_p7, %s571_s14, %s107_s21  }
   0xd   : > { %p162_p10 = pnand %p422_p6, %p161_p9 }
   0xe   : > { %p190_p11 = scmp.lt.s32.totalorder (!%p162_p10), %s575_s15, 1  ;;  %s186_s30 = sand.u32 (!%p162_p10), 1, %s567_s13  }
   0xf   : > { %165 = sbr.rel (%p162_p10) target bundleno = 182 (0xb6), region = 32  ;;  %s442_s6 = sshll.u32 (!%p162_p10), %s575_s15, 6 }
  0x10   : > { %s335_s9 = scalar_lea.hbm (!%p162_p10), %s744_s3, %s442_s6  ;;  %s322_s11 = scalar_lea.sflag (!%p162_p10), [#allocation3], %s186_s30 }
  0x14   : > { %v585_v0 = vmov 0   ;;  %s191_s26 = scalar_select %p190_p11, %s575_s15, 1  ;;  %v211_v1 = vld [vmem:[%s743_s2 + $0x10] sm:$0xff]  ;;  %v209_v2 = vld [vmem:[%s743_s2] sm:$0xff]  ;;  %v212_v4 = vld [vmem:[%s743_s2 + $0x18] sm:$0xff]  ;;  %vm250_vm0 = vcmask 1042432  }
  0x15   : > { %504 = vset.pattern.permute.xlu1 %v585_v0  ;;  %503 = vset.pattern.permute.xlu0 %v585_v0  ;;  %v210_v5 = vld [vmem:[%s743_s2 + $0x8] sm:$0xff]  ;;  %v201_v6 = vld [vmem:[%s742_s1] sm:$0xff]  ;;  %v203_v7 = vld [vmem:[%s742_s1 + $0x10] sm:$0xff]  ;;  %vm237_vm1 = vcmask 23552   ;;  %s338_s15 = sshll.u32 %s335_s9, 4  ;;  %s339_s15 = int_to_ptr.hbm [resolvable:$true] %s338_s15 }
  0x16   : > { %225 = vperm.xlu1 %504, %v211_v1   ;;  %s441_s4 = sshll.u32 %s191_s26, 3  ;;  %215 = vperm.xlu0 %503, %v209_v2   ;;  %v205_v8 = vmul.f32 0.8164966, %v201_v6  ;;  %v207_v9 = vmul.f32 0.8164966, %v203_v7  ;;  %v202_v12 = vld [vmem:[%s742_s1 + $0x8] sm:$0xff] }
  0x17   : > { %s197_s7 = scalar_lea.vmem %s741_s0, %s441_s4  ;;  %v204_v13 = vld [vmem:[%s742_s1 + $0x18] sm:$0xff]  ;;  %v206_v14 = vmul.f32 0.8164966, %v202_v12  ;;  %s423_s4 = sshll.u32 %s186_s30, 6 }
  0x18   : > { %v200_v3 = vld [vmem:[%s197_s7] sm:$0x77]  ;;  %v208_v15 = vmul.f32 0.8164966, %v204_v13  ;;  %s188_s5 = scalar_lea.vmem [#allocation2], %s423_s4  ;;  %s519_s18 = sshra.s32 %s339_s15, 4  ;;  %s520_s18 = int_to_ptr.hbm [resolvable:$true] %s519_s18 }
  0x19   : > { %234 = vst [vmem:[#allocation1] ss:$2 sm:$0xff] %v200_v3  ;;  %s336_s10 = sshll.u32 %s188_s5, 4  ;;  %s521_s19 = scalar_lea.hbm %s520_s18, 64  ;;  %s337_s10 = int_to_ptr.vmem [resolvable:$true] %s336_s10 }
  0x1a   : > { %p522_p12 = scmp.ne.s32.totalorder %s520_s18, %s521_s19  ;;  %s525_s26 = scalar_lea.hbm %s744_s3, 128 }
  0x1b   : > { %p526_p1 = scmp.lt.s32.totalorder %s520_s18, %s744_s3  ;;  %p527_p2 = scmp.lt.s32.totalorder %s525_s26, %s521_s19 }
  0x1c   : > { %p523_p13 = pnand %p522_p12, %p648_p4 }
  0x1d   : > { %p528_p3 = por %p527_p2, %p526_p1 }
  0x1e   : > { %230 = vperm.xlu1 %504, %v212_v4   ;;  %220 = vperm.xlu0 %503, %v210_v5   ;;  %p524_p0 = pneg %p523_p13 }
  0x20   : > { %v235_v10 = vld.sshfl [vmem:[#allocation1] sm:$0xff pattern:$0x75316420]  ;;  %v236_v11 = vld.sshfl [vmem:[#allocation1 + $0x8] sm:$0xff pattern:$0x75316420]  ;;  %p529_p5 = pnand %p528_p3, %p524_p0 }
  0x21   : > { %426 = vmatpush.msk.msra.mxu0 %vm250_vm0, %v235_v10  ;;  %443 = vmatpush.msk.msra.mxu2 %vm250_vm0, %v235_v10 }
  0x22   : > { %431 = vmatpush.msk.msra.mxu1 %vm250_vm0, %v236_v11  ;;  %444 = vmatpush.msk.msra.mxu3 %vm250_vm0, %v236_v11 }
  0x23   : > { %427 = vmatmul.msk.f32.vlgmr.msra.gmra.mxu0 %vm237_vm1, %v205_v8  ;;  %429 = vmatmul.msk.f32.vlgmr.msra.gmra.mxu2 %vm237_vm1, %v207_v9 }
  0x24   : > { %432 = vmatmul.msk.f32.vlgmr.msra.gmra.mxu1 %vm237_vm1, %v205_v8  ;;  %434 = vmatmul.msk.f32.vlgmr.msra.gmra.mxu3 %vm237_vm1, %v207_v9 }
  0x2b   : > { %428 = vmatmul.msk.f32.gmra.mxu0 %vm237_vm1, %v206_v14  ;;  %430 = vmatmul.msk.f32.gmra.mxu2 %vm237_vm1, %v208_v15 }
  0x2c   : > { %433 = vmatmul.msk.f32.gmra.mxu1 %vm237_vm1, %v206_v14  ;;  %435 = vmatmul.msk.f32.gmra.mxu3 %vm237_vm1, %v208_v15 }
  0x88   : > { %v216_v16 = vpop.permute.xlu0 %215  ;;  %v226_v21 = vpop.permute.xlu1 %225 }
  0x90   : > { %v221_v25 = vpop.permute.xlu0 %220  ;;  %v231_v31 = vpop.permute.xlu1 %230 }
  0xa0   : > { %v272_v17 = vpop.f32.mrf.mxu0 }
  0xa1   : > { %v273_v18 = vadd.f32 %v272_v17, %v216_v16  ;;  %v301_v19 = vpop.f32.mrf.mxu1 }
  0xa2   : > { %v302_v20 = vadd.f32 %v301_v19, %v216_v16 }
  0xa3   : > { %313 = vst [vmem:[%s188_s5] sm:$0xff] %v273_v18 }
  0xa4   : > { %314 = vst [vmem:[%s188_s5 + $0x8] sm:$0xff] %v302_v20 }
  0xa6   : > { %v278_v22 = vpop.f32.mrf.mxu2 }
  0xa7   : > { %v279_v23 = vadd.f32 %v278_v22, %v226_v21  ;;  %v307_v24 = vpop.f32.mrf.mxu3 }
  0xa8   : > { %v308_v26 = vadd.f32 %v307_v24, %v226_v21  ;;  %v275_v27 = vpop.f32.mrf.mxu0 }
  0xa9   : > { %317 = vst [vmem:[%s188_s5 + $0x20] sm:$0xff] %v279_v23  ;;  %v276_v28 = vadd.f32 %v275_v27, %v221_v25  ;;  %v304_v29 = vpop.f32.mrf.mxu1 }
  0xaa   : > { %318 = vst [vmem:[%s188_s5 + $0x28] sm:$0xff] %v308_v26  ;;  %v305_v30 = vadd.f32 %v304_v29, %v221_v25 }
  0xab   : > { %315 = vst [vmem:[%s188_s5 + $0x10] sm:$0xff] %v276_v28 }
  0xac   : > { %316 = vst [vmem:[%s188_s5 + $0x18] sm:$0xff] %v305_v30 }
  0xae   : > { %v281_v32 = vpop.f32.mrf.mxu2 }
  0xaf   : > { %v282_v33 = vadd.f32 %v281_v32, %v231_v31  ;;  %v310_v34 = vpop.f32.mrf.mxu3 }
  0xb0   : > { %v311_v35 = vadd.f32 %v310_v34, %v231_v31 }
  0xb1   : > { %319 = vst [vmem:[%s188_s5 + $0x30] sm:$0xff] %v282_v33 }
  0xb2   : > { %320 = vst [vmem:[%s188_s5 + $0x38] sm:$0xff] %v311_v35 }
  0xb3   : > { %532 = shalt.err (!%p529_p5)
}
  0xb4   : > { %s586_s29 = smov 256   ;;  %s587_s30 = smov 16  }
  0xb5   : > { %445 = dma.vmem_to_hbm [thread:$0]  (%p648_p4), %s337_s10, 1024, %s339_s15, %s322_s11, %s586_s29, %s586_s29, %s587_s30  }
  0xb6 PF: > { %p451_p6 = scmp.ge.s32.totalorder %s583_s17, 2  ;;  %s353_s4 = sand.u32 1, %s563_s12  }
  0xb7   : > { %s354_s5 = scalar_lea.sflag [#allocation3], %s353_s4 }
  0xb8   : > { %p448_p7 = pnand %p451_p6, %p655_p8 }
  0xba   : > { %p449_p9 = pneg %p448_p7 }
  0xbc   : > { %558 = dma.done.wait (%p449_p9), %s354_s5, 1024  }
  0xbd   : > { %560 = vsyncadd (%p449_p9), %s354_s5, 4294966272  ;;  %s16_s17 = sadd.s32 1, %s583_s17   ;;  %s747_s12 = smov %s567_s13 }
  0xbe   : > { %p13_p10 = scmp.ge.s32.totalorder %s16_s17, 4   ;;  %s748_s13 = smov %s571_s14 }
  0xbf   : > { %s749_s14 = smov %s661_s25  ;;  %s750_s15 = smov %s579_s16 }
  0xc0   : > { %s751_s16 = smov %s753_s20  ;;  %15 = sbr.rel (!%p13_p10) target bundleno = 4 (0x4), region = 67 }
  0xc5   :  { %360 = vsyncpa [#allocation3], 1 }
  0xc6   :  { %362 = vsyncpa [#allocation3 + $0x1], 1 }

</bundles_post_ra>
